<compile_context>
chip_gen: v6e
topology: v6e:2x2x1
jax: 0.10.0
libtpu: 0.0.40
codegen_flags: <defaults>
</compile_context>

<pallas_src>
import jax
import jax.numpy as jnp
from jax.experimental import pallas as pl
from jax.experimental.pallas import tpu as pltpu


def critic_kernel(s_ref, a_ref, w1s_ref, w1a_ref, b1_ref, w2_ref, b2_ref,
                  wq_ref, bq_ref, q_ref):
    # ---- layer 1: split-K matmul over (state | action), f32 accumulate ----
    h1 = jnp.dot(s_ref[...], w1s_ref[...], preferred_element_type=jnp.float32)
    h1 = h1 + jnp.dot(a_ref[...], w1a_ref[...],
                      preferred_element_type=jnp.float32)
    h1 = jnp.maximum(h1 + b1_ref[...], 0.0)          # f32 epilogue (VPU)

    # ---- layer 2: 256x256 matmul (bf16 on v6e/v7x via w2 dtype), f32 acc ----
    h2 = jnp.dot(h1.astype(w2_ref.dtype), w2_ref[...],
                 preferred_element_type=jnp.float32)
    h2 = jnp.maximum(h2 + b2_ref[...], 0.0)          # f32 epilogue (VPU)

    # ---- q head: VPU multiply + XLU lane-reduction instead of N=1 MXU dot ---
    q = jnp.sum(h2 * wq_ref[...], axis=-1, keepdims=True) + bq_ref[0, 0]  # (TM,1)

    # ---- lane-dense store: broadcast into the (TM, 128) output slab --------
    q_ref[...] = jnp.broadcast_to(q, q_ref.shape).astype(q_ref.dtype)


def critic_forward(state, action, params, *, tile_m=128,
                   compute_dtype=jnp.float32):
    """state: (B, input_dims), action: (B, n_actions) -> q: (B, 1).

    compute_dtype: dtype of the layer-2 matmul operands (use jnp.bfloat16 on
    v6e/v7x for MXU + bandwidth headroom; accumulation is always f32).
    """
    w1s, w1a, b1, w2, b2, wq, bq = params
    B, Ds = state.shape
    Da = action.shape[1]
    F1 = w1s.shape[1]
    F2 = w2.shape[1]

    grid_m = pl.cdiv(B, tile_m)
    b_pad = grid_m * tile_m

    s = state.astype(jnp.float32)
    a = action.astype(jnp.float32)
    if b_pad != B:  # pad batch to a whole number of tiles (static shapes)
        s = jnp.pad(s, ((0, b_pad - B), (0, 0)))
        a = jnp.pad(a, ((0, b_pad - B), (0, 0)))

    w2_c = w2.astype(compute_dtype)  # bf16 here is the dominant byte/FLOP win

    out = pl.pallas_call(
        critic_kernel,
        out_shape=jax.ShapeDtypeStruct((b_pad, 128), jnp.float32),
        grid=(grid_m,),
        in_specs=[
            pl.BlockSpec((tile_m, Ds), lambda i: (i, 0)),    # state tile
            pl.BlockSpec((tile_m, Da), lambda i: (i, 0)),    # action tile
            pl.BlockSpec((Ds, F1), lambda i: (0, 0)),        # W1[:input_dims]
            pl.BlockSpec((Da, F1), lambda i: (0, 0)),        # W1[input_dims:]
            pl.BlockSpec((1, F1), lambda i: (0, 0)),         # b1
            pl.BlockSpec((F1, F2), lambda i: (0, 0)),        # W2
            pl.BlockSpec((1, F2), lambda i: (0, 0)),         # b2
            pl.BlockSpec((1, F2), lambda i: (0, 0)),         # Wq (row)
            pl.BlockSpec(memory_space=pltpu.MemorySpace.SMEM),  # bq scalar
        ],
        out_specs=pl.BlockSpec((tile_m, 128), lambda i: (i, 0)),
        compiler_params=pltpu.CompilerParams(
            dimension_semantics=("parallel",)),  # 2 TCs on v7x; no-op on v5e/v6e
    )(s, a, w1s, w1a, b1, w2_c, b2, wq, bq)

    return out[:B, :1]


def init_params(key, input_dims, n_actions, fc1_dims=256, fc2_dims=256):
    """Matches nn.Linear's default U(-1/sqrt(fan_in), 1/sqrt(fan_in)) init.

    W1 is stored split (state-part / action-part), transposed to
    (in_features, out_features); Wq is stored as a (1, fc2) row for the VPU
    head; bq is a (1,1) scalar (lives in SMEM inside the kernel)."""
    d_in = input_dims + n_actions
    ks = jax.random.split(key, 7)

    def uniform(k, shape, fan_in):
        bound = 1.0 / jnp.sqrt(jnp.float32(fan_in))
        return jax.random.uniform(k, shape, jnp.float32, -bound, bound)

    w1s = uniform(ks[0], (input_dims, fc1_dims), d_in)
    w1a = uniform(ks[1], (n_actions, fc1_dims), d_in)
    b1 = uniform(ks[2], (1, fc1_dims), d_in)
    w2 = uniform(ks[3], (fc1_dims, fc2_dims), fc1_dims)
    b2 = uniform(ks[4], (1, fc2_dims), fc1_dims)
    wq = uniform(ks[5], (1, fc2_dims), fc2_dims)
    bq = uniform(ks[6], (1, 1), fc2_dims)
    return (w1s, w1a, b1, w2, b2, wq, bq)


def critic_reference(state, action, params):
    """Pure-JAX (f32) reference of the PyTorch forward."""
    w1s, w1a, b1, w2, b2, wq, bq = params
    x = jnp.concatenate([state, action], axis=1)
    w1 = jnp.concatenate([w1s, w1a], axis=0)
    h1 = jnp.maximum(x @ w1 + b1, 0.0)
    h2 = jnp.maximum(h1 @ w2 + b2, 0.0)
    return h2 @ wq.T + bq


if __name__ == "__main__":
    key = jax.random.PRNGKey(0)
    k_param, k_state, k_action = jax.random.split(key, 3)

    input_dims = 8      # state dimension (input_dims[0] in the PyTorch module)
    n_actions = 2
    params = init_params(k_param, input_dims, n_actions)

    # --- small batch (module-scale) -----------------------------------------
    batch = 2
    state = jax.random.normal(k_state, (batch, input_dims), jnp.float32)
    action = jax.random.normal(k_action, (batch, n_actions), jnp.float32)

    q = jax.block_until_ready(critic_forward(state, action, params))
    q_ref = critic_reference(state, action, params)
    assert q.shape == (batch, 1), q.shape
    assert jnp.allclose(q, q_ref, atol=1e-4, rtol=1e-4), (q, q_ref)

    # --- multi-tile batch: exercises the grid, padding and output slicing ---
    batch2 = 300
    k_s2, k_a2 = jax.random.split(k_state)
    state2 = jax.random.normal(k_s2, (batch2, input_dims), jnp.float32)
    action2 = jax.random.normal(k_a2, (batch2, n_actions), jnp.float32)
    q2 = jax.block_until_ready(critic_forward(state2, action2, params))
    q2_ref = critic_reference(state2, action2, params)
    assert q2.shape == (batch2, 1), q2.shape
    assert jnp.allclose(q2, q2_ref, atol=1e-4, rtol=1e-4)

    # --- bf16 layer-2 matmul (v6e/v7x MXU path), f32 accumulate: smoke test --
    q2_bf16 = jax.block_until_ready(
        critic_forward(state2, action2, params, compute_dtype=jnp.bfloat16))
    assert q2_bf16.shape == (batch2, 1)
    assert jnp.allclose(q2_bf16, q2_ref, atol=1e-1, rtol=1e-1)

    print("KERNEL_OK")
</pallas_src>

<mosaic_0001>
module attributes {stable_mosaic.version = 11 : i64} {
  func.func @critic_kernel(%arg0: i32, %arg1: memref<128x8xf32, #tpu.memory_space<vmem>>, %arg2: memref<128x2xf32, #tpu.memory_space<vmem>>, %arg3: memref<8x256xf32, #tpu.memory_space<vmem>>, %arg4: memref<2x256xf32, #tpu.memory_space<vmem>>, %arg5: memref<1x256xf32, #tpu.memory_space<vmem>>, %arg6: memref<256x256xf32, #tpu.memory_space<vmem>>, %arg7: memref<1x256xf32, #tpu.memory_space<vmem>>, %arg8: memref<1x256xf32, #tpu.memory_space<vmem>>, %arg9: memref<1x1xf32, #tpu.memory_space<smem>>, %arg10: memref<128x128xf32, #tpu.memory_space<vmem>>) attributes {dimension_semantics = [#tpu.dimension_semantics<parallel>], iteration_bounds = array<i64: 1>, scalar_prefetch = 0 : i64, scratch_operands = 0 : i64, tpu.core_type = #tpu.core_type<tc>, window_params = [{transform_indices = @transform_0, window_bounds = array<i64: 128, 8>}, {transform_indices = @transform_1, window_bounds = array<i64: 128, 2>}, {pipeline_mode = #tpu.pipeline_mode<synchronous>, transform_indices = @transform_2, window_bounds = array<i64: 8, 256>}, {pipeline_mode = #tpu.pipeline_mode<synchronous>, transform_indices = @transform_3, window_bounds = array<i64: 2, 256>}, {pipeline_mode = #tpu.pipeline_mode<synchronous>, transform_indices = @transform_4, window_bounds = array<i64: 1, 256>}, {pipeline_mode = #tpu.pipeline_mode<synchronous>, transform_indices = @transform_5, window_bounds = array<i64: 256, 256>}, {pipeline_mode = #tpu.pipeline_mode<synchronous>, transform_indices = @transform_6, window_bounds = array<i64: 1, 256>}, {pipeline_mode = #tpu.pipeline_mode<synchronous>, transform_indices = @transform_7, window_bounds = array<i64: 1, 256>}, {transform_indices = @transform_8, window_bounds = array<i64: 1, 1>}, {transform_indices = @transform_9, window_bounds = array<i64: 128, 128>}]} {
    %c0 = arith.constant 0 : index
    %c0_0 = arith.constant 0 : index
    %0 = vector.load %arg1[%c0, %c0_0] : memref<128x8xf32, #tpu.memory_space<vmem>>, vector<128x8xf32>
    %c0_1 = arith.constant 0 : index
    %c0_2 = arith.constant 0 : index
    %1 = vector.load %arg3[%c0_1, %c0_2] : memref<8x256xf32, #tpu.memory_space<vmem>>, vector<8x256xf32>
    %cst = arith.constant dense<0.000000e+00> : vector<128x256xf32>
    %2 = tpu.matmul %0, %1, %cst {dimension_numbers = #tpu.dot_dimension_numbers<[1], [0], [0], [1], [0, 0, 1, 1], [], []>} : vector<128x8xf32>, vector<8x256xf32>, vector<128x256xf32> -> vector<128x256xf32>
    %c0_3 = arith.constant 0 : index
    %c0_4 = arith.constant 0 : index
    %3 = vector.load %arg2[%c0_3, %c0_4] : memref<128x2xf32, #tpu.memory_space<vmem>>, vector<128x2xf32>
    %c0_5 = arith.constant 0 : index
    %c0_6 = arith.constant 0 : index
    %4 = vector.load %arg4[%c0_5, %c0_6] : memref<2x256xf32, #tpu.memory_space<vmem>>, vector<2x256xf32>
    %cst_7 = arith.constant dense<0.000000e+00> : vector<128x256xf32>
    %5 = tpu.matmul %3, %4, %cst_7 {dimension_numbers = #tpu.dot_dimension_numbers<[1], [0], [0], [1], [0, 0, 1, 1], [], []>} : vector<128x2xf32>, vector<2x256xf32>, vector<128x256xf32> -> vector<128x256xf32>
    %6 = arith.addf %2, %5 : vector<128x256xf32>
    %c0_8 = arith.constant 0 : index
    %c0_9 = arith.constant 0 : index
    %7 = vector.load %arg5[%c0_8, %c0_9] : memref<1x256xf32, #tpu.memory_space<vmem>>, vector<1x256xf32>
    %8 = vector.broadcast %7 : vector<1x256xf32> to vector<128x256xf32>
    %9 = arith.addf %6, %8 : vector<128x256xf32>
    %cst_10 = arith.constant 0.000000e+00 : f32
    %10 = vector.broadcast %cst_10 : f32 to vector<128x256xf32>
    %11 = arith.maximumf %9, %10 : vector<128x256xf32>
    %c0_11 = arith.constant 0 : index
    %c0_12 = arith.constant 0 : index
    %12 = vector.load %arg6[%c0_11, %c0_12] : memref<256x256xf32, #tpu.memory_space<vmem>>, vector<256x256xf32>
    %cst_13 = arith.constant dense<0.000000e+00> : vector<128x256xf32>
    %13 = tpu.matmul %11, %12, %cst_13 {dimension_numbers = #tpu.dot_dimension_numbers<[1], [0], [0], [1], [0, 0, 1, 1], [], []>} : vector<128x256xf32>, vector<256x256xf32>, vector<128x256xf32> -> vector<128x256xf32>
    %c0_14 = arith.constant 0 : index
    %c0_15 = arith.constant 0 : index
    %14 = vector.load %arg7[%c0_14, %c0_15] : memref<1x256xf32, #tpu.memory_space<vmem>>, vector<1x256xf32>
    %15 = vector.broadcast %14 : vector<1x256xf32> to vector<128x256xf32>
    %16 = arith.addf %13, %15 : vector<128x256xf32>
    %cst_16 = arith.constant 0.000000e+00 : f32
    %17 = vector.broadcast %cst_16 : f32 to vector<128x256xf32>
    %18 = arith.maximumf %16, %17 : vector<128x256xf32>
    %c0_17 = arith.constant 0 : index
    %c0_18 = arith.constant 0 : index
    %19 = vector.load %arg8[%c0_17, %c0_18] : memref<1x256xf32, #tpu.memory_space<vmem>>, vector<1x256xf32>
    %20 = vector.broadcast %19 : vector<1x256xf32> to vector<128x256xf32>
    %21 = arith.mulf %18, %20 : vector<128x256xf32>
    %cst_19 = arith.constant dense<0.000000e+00> : vector<128xf32>
    %22 = vector.multi_reduction <add>, %21, %cst_19 [1] : vector<128x256xf32> to vector<128xf32>
    %23 = vector.shape_cast %22 : vector<128xf32> to vector<128x1xf32>
    %c0_20 = arith.constant 0 : index
    %c0_21 = arith.constant 0 : index
    %24 = memref.load %arg9[%c0_20, %c0_21] : memref<1x1xf32, #tpu.memory_space<smem>>
    %25 = vector.broadcast %24 : f32 to vector<128x1xf32>
    %26 = arith.addf %23, %25 : vector<128x1xf32>
    %27 = vector.shape_cast %26 : vector<128x1xf32> to vector<128x1xf32>
    %28 = vector.broadcast %27 : vector<128x1xf32> to vector<128x128xf32>
    %c0_22 = arith.constant 0 : index
    %c0_23 = arith.constant 0 : index
    %29 = vector.load %arg10[%c0_22, %c0_23] : memref<128x128xf32, #tpu.memory_space<vmem>>, vector<128x128xf32>
    tpu.vector_store %arg10[%c0_22, %c0_23], %28 {strides = array<i32>} : memref<128x128xf32, #tpu.memory_space<vmem>>, vector<128x128xf32>,
    return
  }
  func.func @transform_0(%arg0: i32) -> (i32, i32) {
    %c0_i32 = arith.constant 0 : i32
    %c0_i32_0 = arith.constant 0 : i32
    return %arg0, %c0_i32 : i32, i32
  }
  func.func @transform_1(%arg0: i32) -> (i32, i32) {
    %c0_i32 = arith.constant 0 : i32
    %c0_i32_0 = arith.constant 0 : i32
    return %arg0, %c0_i32 : i32, i32
  }
  func.func @transform_2(%arg0: i32) -> (i32, i32) {
    %c0_i32 = arith.constant 0 : i32
    %c0_i32_0 = arith.constant 0 : i32
    %c0_i32_1 = arith.constant 0 : i32
    return %c0_i32, %c0_i32_0 : i32, i32
  }
  func.func @transform_3(%arg0: i32) -> (i32, i32) {
    %c0_i32 = arith.constant 0 : i32
    %c0_i32_0 = arith.constant 0 : i32
    %c0_i32_1 = arith.constant 0 : i32
    return %c0_i32, %c0_i32_0 : i32, i32
  }
  func.func @transform_4(%arg0: i32) -> (i32, i32) {
    %c0_i32 = arith.constant 0 : i32
    %c0_i32_0 = arith.constant 0 : i32
    %c0_i32_1 = arith.constant 0 : i32
    return %c0_i32, %c0_i32_0 : i32, i32
  }
  func.func @transform_5(%arg0: i32) -> (i32, i32) {
    %c0_i32 = arith.constant 0 : i32
    %c0_i32_0 = arith.constant 0 : i32
    %c0_i32_1 = arith.constant 0 : i32
    return %c0_i32, %c0_i32_0 : i32, i32
  }
  func.func @transform_6(%arg0: i32) -> (i32, i32) {
    %c0_i32 = arith.constant 0 : i32
    %c0_i32_0 = arith.constant 0 : i32
    %c0_i32_1 = arith.constant 0 : i32
    return %c0_i32, %c0_i32_0 : i32, i32
  }
  func.func @transform_7(%arg0: i32) -> (i32, i32) {
    %c0_i32 = arith.constant 0 : i32
    %c0_i32_0 = arith.constant 0 : i32
    %c0_i32_1 = arith.constant 0 : i32
    return %c0_i32, %c0_i32_0 : i32, i32
  }
  func.func @transform_8(%arg0: i32) -> (i32, i32) {
    %c0_i32 = arith.constant 0 : i32
    %c0_i32_0 = arith.constant 0 : i32
    %c0_i32_1 = arith.constant 0 : i32
    return %c0_i32, %c0_i32_0 : i32, i32
  }
  func.func @transform_9(%arg0: i32) -> (i32, i32) {
    %c0_i32 = arith.constant 0 : i32
    %c0_i32_0 = arith.constant 0 : i32
    return %arg0, %c0_i32 : i32, i32
  }
}

</mosaic_0001>

<bundles_post_ra>
// kernel: tpu_custom_call.1
= control target key start
LH: loop header
LB: loop body
LE: loop exit
PB: predicated region body
PF: predicated region fallthrough
CT: control target
= control target key end

     0   :  { %15 = vsyncpa [#allocation4], 0  ;;  %s1713_s0 = inlined_call_operand.vmem [shape: f32[128,8], index: 0, kind: input, shape index: {}]   ;;  %s1714_s1 = inlined_call_operand.vmem [shape: f32[128,2], index: 1, kind: input, shape index: {}]   ;;  %s1715_s2 = inlined_call_operand.vmem [shape: f32[8,256], index: 2, kind: input, shape index: {}]   ;;  %s1716_s3 = inlined_call_operand.vmem [shape: f32[2,256], index: 3, kind: input, shape index: {}]   ;;  %s1717_s4 = inlined_call_operand.vmem [shape: f32[1,256], index: 4, kind: input, shape index: {}]   ;;  %s1718_s5 = inlined_call_operand.hbm [shape: f32[256,256], index: 5, kind: input, shape index: {}]   ;;  %s1719_s6 = inlined_call_operand.vmem [shape: f32[1,256], index: 6, kind: input, shape index: {}]   ;;  %s1720_s7 = inlined_call_operand.vmem [shape: f32[1,256], index: 7, kind: input, shape index: {}]   ;;  %s1721_s8 = inlined_call_operand.<no memory space> [shape: f32[1,1], index: 8, kind: input, shape index: {}]   ;;  %s1722_s9 = inlined_call_operand.hbm [shape: f32[128,128], index: 9, kind: output, shape index: {}]  }
   0x1   :  { %16 = vsyncpa [#allocation5], 0  ;;  %s1155_s30 = smov [#allocation3]  }
   0x2   :  { %s32_s10 = sshll.u32 %s1155_s30, 4  ;;  %s33_s10 = int_to_ptr.vmem [resolvable:$true] %s32_s10 }
   0x3   :  { %s1119_s11 = scalar_lea.vmem %s33_s10, 8192  ;;  %p1124_p1 = scmp.lt.s32.totalorder %s33_s10, %s33_s10 }
   0x4   :  { %p1120_p0 = scmp.ne.s32.totalorder %s33_s10, %s1119_s11  ;;  %p1125_p2 = scmp.lt.s32.totalorder %s1119_s11, %s1119_s11 }
   0x6   :  { %p1126_p3 = por %p1125_p2, %p1124_p1 }
   0x8   :  { %p1127_p4 = pnand %p1126_p3, %p1120_p0 }
   0xa   :  { %1130 = shalt.err (!%p1127_p4)
}
   0xb   :  { %s1156_s12 = smov 256   ;;  %s1157_s13 = smov 16  }
   0xc   :  { %38 = dma.hbm_to_vmem [thread:$0]  %s1718_s5, 8192, %s33_s10, [#allocation4], %s1156_s12, %s1156_s12, %s1157_s13  }
   0xd   :  { %1151 = dma.done.wait [#allocation4], 8192  }
   0xe   :  { %1152 = vsyncadd [#allocation4], 4294959104  ;;  %v1158_v0 = vmov 0.0   ;;  %vm141_vm0 = vcmask 1041408   ;;  %vm307_vm1 = vcmask 64512   ;;  %v65_v1 = vld [vmem:[%s1715_s2 + $0x8] sm:$0xff] }
   0xf   :  { %420 = vmatprep.mubr.f32.mxu1 %v1158_v0  ;;  %210 = vmatprep.mubr.f32.mxu0 %v1158_v0  ;;  %v64_v2 = vld [vmem:[%s1715_s2] sm:$0xff]  ;;  %vm92_vm2 = vcmask 15360   ;;  %v49_v7 = vld [vmem:[%s1713_s0 + $0x8] sm:$0xff]  ;;  %v50_v9 = vld [vmem:[%s1713_s0 + $0x10] sm:$0xff] }
  0x10   :  { %v1005_v3 = vld.sshfl [vmem:[%s1716_s3] sm:$0x33 pattern:$0x76325410]  ;;  %386 = vmatprep.subr.mxu1 %v65_v1  ;;  %v67_v8 = vld [vmem:[%s1714_s1 + $0x8] sm:$0xff]  ;;  %v68_v10 = vld [vmem:[%s1714_s1 + $0x10] sm:$0xff] }
  0x11   :  { %v91_v4 = vcombine.high %v1005_v3, %v1005_v3  ;;  %v48_v5 = vld [vmem:[%s1713_s0] sm:$0xff]  ;;  %387 = vmatpush1.msra.mxu1 %v64_v2  ;;  %v624_v11 = vld [vmem:[#allocation3 + $0xf8] sm:$0xff]  ;;  %v1257_v13 = vld [vmem:[#allocation3 + $0xf0] sm:$0xff] }
  0x12   :  { %v66_v6 = vld [vmem:[%s1714_s1] sm:$0xff]  ;;  %1024 = vmatmul.mubr.msk.f32.vlgmr.msra.gmra.mxu1 %vm307_vm1, %v48_v5  ;;  %v51_v12 = vld [vmem:[%s1713_s0 + $0x18] sm:$0xff]  ;;  %v1259_v14 = vld [vmem:[#allocation3 + $0xe8] sm:$0xff]  ;;  %1040 = vmatprep.subr.mxu1 %v624_v11 }
  0x13   :  { %1006 = vmatprep.subr.msk.mxu0 %vm141_vm0, %v91_v4  ;;  %426 = vmatprep.mubr.f32.mxu1 %v1158_v0  ;;  %v1262_v15 = vld [vmem:[#allocation3 + $0xe0] sm:$0xff]  ;;  %v69_v16 = vld [vmem:[%s1714_s1 + $0x18] sm:$0xff]  ;;  %v1273_v18 = vld [vmem:[#allocation3 + $0xd0] sm:$0xff] }
  0x14   :  { %1007 = vmatpush1.msk.msra.mxu0 %vm141_vm0, %v1005_v3  ;;  %v1269_v17 = vld [vmem:[#allocation3 + $0xd8] sm:$0xff]  ;;  %v52_v19 = vld [vmem:[%s1713_s0 + $0x20] sm:$0xff]  ;;  %v1280_v20 = vld [vmem:[#allocation3 + $0xc8] sm:$0xff]  ;;  %1072 = vmatpush1.msra.mxu1 %v1257_v13 }
  0x15   :  { %1008 = vmatmul.mubr.msk.f32.vlgmr.msra.gmra.mxu0 %vm92_vm2, %v66_v6  ;;  %669 = vmatprep.subr.mxu0 %v624_v11  ;;  %v1284_v21 = vld [vmem:[#allocation3 + $0xc0] sm:$0xff]  ;;  %v1291_v23 = vld [vmem:[#allocation3 + $0xb8] sm:$0xff]  ;;  %v1295_v24 = vld [vmem:[#allocation3 + $0xb0] sm:$0xff] }
  0x16   :  { %216 = vmatprep.mubr.f32.mxu0 %v1158_v0  ;;  %1025 = vmatmul.mubr.msk.f32.gmra.mxu1 %vm307_vm1, %v49_v7  ;;  %v70_v22 = vld [vmem:[%s1714_s1 + $0x20] sm:$0xff]  ;;  %v53_v25 = vld [vmem:[%s1713_s0 + $0x28] sm:$0xff]  ;;  %v1313_v29 = vld [vmem:[#allocation3 + $0x98] sm:$0xff] }
  0x17   :  { %432 = vmatprep.mubr.f32.mxu1 %v1158_v0  ;;  %670 = vmatpush1.msra.mxu0 %v1257_v13  ;;  %v1302_v26 = vld [vmem:[#allocation3 + $0xa8] sm:$0xff]  ;;  %v1306_v27 = vld [vmem:[#allocation3 + $0xa0] sm:$0xff]  ;;  %v1317_v30 = vld [vmem:[#allocation3 + $0x90] sm:$0xff] }
  0x18   :  { %671 = vmatprep.subr.mxu0 %v1259_v14  ;;  %v71_v28 = vld [vmem:[%s1714_s1 + $0x28] sm:$0xff]  ;;  %v54_v31 = vld [vmem:[%s1713_s0 + $0x30] sm:$0xff]  ;;  %v1328_v33 = vld [vmem:[#allocation3 + $0x80] sm:$0xff]  ;;  %1041 = vmatprep.subr.mxu1 %v1259_v14 }
  0x19   :  { %1009 = vmatmul.mubr.msk.f32.gmra.mxu0 %vm92_vm2, %v67_v8  ;;  %v1324_v32 = vld [vmem:[#allocation3 + $0x88] sm:$0xff]  ;;  %v72_v34 = vld [vmem:[%s1714_s1 + $0x30] sm:$0xff]  ;;  %v1335_v35 = vld [vmem:[#allocation3 + $0x78] sm:$0xff]  ;;  %1073 = vmatpush1.msra.mxu1 %v1262_v15 }
  0x1a   :  { %222 = vmatprep.mubr.f32.mxu0 %v1158_v0  ;;  %1026 = vmatmul.mubr.msk.f32.gmra.mxu1 %vm307_vm1, %v50_v9  ;;  %v1339_v36 = vld [vmem:[#allocation3 + $0x70] sm:$0xff]  ;;  %v55_v37 = vld [vmem:[%s1713_s0 + $0x38] sm:$0xff]  ;;  %v1346_v38 = vld [vmem:[#allocation3 + $0x68] sm:$0xff] }
  0x1b   :  { %438 = vmatprep.mubr.f32.mxu1 %v1158_v0  ;;  %672 = vmatpush1.msra.mxu0 %v1262_v15  ;;  %v1350_v39 = vld [vmem:[#allocation3 + $0x60] sm:$0xff]  ;;  %v73_v40 = vld [vmem:[%s1714_s1 + $0x38] sm:$0xff]  ;;  %v1361_v42 = vld [vmem:[#allocation3 + $0x50] sm:$0xff] }
  0x1c   :  { %673 = vmatprep.subr.mxu0 %v1269_v17  ;;  %v1357_v41 = vld [vmem:[#allocation3 + $0x58] sm:$0xff]  ;;  %v56_v43 = vld [vmem:[%s1713_s0 + $0x40] sm:$0xff]  ;;  %v1368_v44 = vld [vmem:[#allocation3 + $0x48] sm:$0xff]  ;;  %1042 = vmatprep.subr.mxu1 %v1269_v17 }
  0x1d   :  { %1010 = vmatmul.mubr.msk.f32.gmra.mxu0 %vm92_vm2, %v68_v10  ;;  %v1372_v45 = vld [vmem:[#allocation3 + $0x40] sm:$0xff]  ;;  %v1379_v47 = vld [vmem:[#allocation3 + $0x38] sm:$0xff]  ;;  %v1383_v48 = vld [vmem:[#allocation3 + $0x30] sm:$0xff]  ;;  %1074 = vmatpush1.msra.mxu1 %v1273_v18 }
  0x1e   :  { %228 = vmatprep.mubr.f32.mxu0 %v1158_v0  ;;  %1027 = vmatmul.mubr.msk.f32.gmra.mxu1 %vm307_vm1, %v51_v12  ;;  %v74_v46 = vld [vmem:[%s1714_s1 + $0x40] sm:$0xff]  ;;  %v57_v49 = vld [vmem:[%s1713_s0 + $0x48] sm:$0xff]  ;;  %v1401_v53 = vld [vmem:[#allocation3 + $0x18] sm:$0xff] }
  0x1f   :  { %444 = vmatprep.mubr.f32.mxu1 %v1158_v0  ;;  %674 = vmatpush1.msra.mxu0 %v1273_v18  ;;  %v1390_v50 = vld [vmem:[#allocation3 + $0x28] sm:$0xff]  ;;  %v1394_v51 = vld [vmem:[#allocation3 + $0x20] sm:$0xff]  ;;  %v1405_v54 = vld [vmem:[#allocation3 + $0x10] sm:$0xff] }
  0x20   :  { %675 = vmatprep.subr.mxu0 %v1280_v20  ;;  %v75_v52 = vld [vmem:[%s1714_s1 + $0x48] sm:$0xff]  ;;  %v58_v55 = vld [vmem:[%s1713_s0 + $0x50] sm:$0xff]  ;;  %v1416_v57 = vld [vmem:[#allocation3] sm:$0xff]  ;;  %1043 = vmatprep.subr.mxu1 %v1280_v20 }
  0x21   :  { %1011 = vmatmul.mubr.msk.f32.gmra.mxu0 %vm92_vm2, %v69_v16  ;;  %v1412_v56 = vld [vmem:[#allocation3 + $0x8] sm:$0xff]  ;;  %v76_v58 = vld [vmem:[%s1714_s1 + $0x50] sm:$0xff]  ;;  %v1425_v59 = vld [vmem:[#allocation3 + $0x1f8] sm:$0xff]  ;;  %1075 = vmatpush1.msra.mxu1 %v1284_v21 }
  0x22   :  { %234 = vmatprep.mubr.f32.mxu0 %v1158_v0  ;;  %1028 = vmatmul.mubr.msk.f32.gmra.mxu1 %vm307_vm1, %v52_v19  ;;  %v59_v60 = vld [vmem:[%s1713_s0 + $0x58] sm:$0xff]  ;;  %v1434_v61 = vld [vmem:[#allocation3 + $0x1f0] sm:$0xff]  ;;  %v1443_v63 = vld [vmem:[#allocation3 + $0x1e8] sm:$0xff] }
  0x23   :  { %450 = vmatprep.mubr.f32.mxu1 %v1158_v0  ;;  %676 = vmatpush1.msra.mxu0 %v1284_v21  ;;  %v77_v62 = vld [vmem:[%s1714_s1 + $0x58] sm:$0xff]  ;;  %v60_v1 = vld [vmem:[%s1713_s0 + $0x60] sm:$0xff]  ;;  %v61_v5 = vld [vmem:[%s1713_s0 + $0x68] sm:$0xff] }
  0x24   :  { %677 = vmatprep.subr.mxu0 %v1291_v23  ;;  %v1452_v2 = vld [vmem:[#allocation3 + $0x1e0] sm:$0xff]  ;;  %v1461_v4 = vld [vmem:[#allocation3 + $0x1d8] sm:$0xff]  ;;  %v1470_v6 = vld [vmem:[#allocation3 + $0x1d0] sm:$0xff]  ;;  %1044 = vmatprep.subr.mxu1 %v1291_v23 }
  0x25   :  { %1012 = vmatmul.mubr.msk.f32.gmra.mxu0 %vm92_vm2, %v70_v22  ;;  %v78_v3 = vld [vmem:[%s1714_s1 + $0x60] sm:$0xff]  ;;  %v79_v7 = vld [vmem:[%s1714_s1 + $0x68] sm:$0xff]  ;;  %v62_v9 = vld [vmem:[%s1713_s0 + $0x70] sm:$0xff]  ;;  %1076 = vmatpush1.msra.mxu1 %v1295_v24 }
  0x26   :  { %240 = vmatprep.mubr.f32.mxu0 %v1158_v0  ;;  %678 = vmatpush1.msra.mxu0 %v1295_v24  ;;  %v1479_v8 = vld [vmem:[#allocation3 + $0x1c8] sm:$0xff]  ;;  %v1488_v10 = vld [vmem:[#allocation3 + $0x1c0] sm:$0xff]  ;;  %v80_v11 = vld [vmem:[%s1714_s1 + $0x70] sm:$0xff] }
  0x27   :  { %1029 = vmatmul.mubr.msk.f32.gmra.mxu1 %vm307_vm1, %v53_v25  ;;  %679 = vmatprep.subr.mxu0 %v1302_v26  ;;  %v1497_v12 = vld [vmem:[#allocation3 + $0x1b8] sm:$0xff]  ;;  %v1506_v14 = vld [vmem:[#allocation3 + $0x1b0] sm:$0xff]  ;;  %v1513_v16 = vld [vmem:[#allocation3 + $0x1a8] sm:$0xff] }
  0x28   :  { %456 = vmatprep.mubr.f32.mxu1 %v1158_v0  ;;  %680 = vmatpush1.msra.mxu0 %v1306_v27  ;;  %v63_v13 = vld [vmem:[%s1713_s0 + $0x78] sm:$0xff]  ;;  %v1517_v17 = vld [vmem:[#allocation3 + $0x1a0] sm:$0xff]  ;;  %v1529_v19 = vld [vmem:[#allocation3 + $0x188] sm:$0xff] }
  0x29   :  { %1013 = vmatmul.mubr.msk.f32.gmra.mxu0 %vm92_vm2, %v71_v28  ;;  %681 = vmatprep.subr.mxu0 %v1313_v29  ;;  %v81_v15 = vld [vmem:[%s1714_s1 + $0x78] sm:$0xff]  ;;  %v1533_v20 = vld [vmem:[#allocation3 + $0x180] sm:$0xff]  ;;  %v1541_v22 = vld [vmem:[#allocation3 + $0x170] sm:$0xff] }
  0x2a   :  { %246 = vmatprep.mubr.f32.mxu0 %v1158_v0  ;;  %682 = vmatpush1.msra.mxu0 %v1317_v30  ;;  %v1521_v18 = vld [vmem:[#allocation3 + $0x198] sm:$0xff]  ;;  %v638_v23 = vld [vmem:[#allocation3 + $0x168] sm:$0xff]  ;;  %v637_v24 = vld [vmem:[#allocation3 + $0x160] sm:$0xff] }
  0x2b   :  { %1030 = vmatmul.mubr.msk.f32.gmra.mxu1 %vm307_vm1, %v54_v31  ;;  %683 = vmatprep.subr.mxu0 %v1324_v32  ;;  %v1537_v21 = vld [vmem:[#allocation3 + $0x178] sm:$0xff]  ;;  %v633_v28 = vld [vmem:[#allocation3 + $0x140] sm:$0xff]  ;;  %v630_v31 = vld [vmem:[#allocation3 + $0x128] sm:$0xff] }
  0x2c   :  { %462 = vmatprep.mubr.f32.mxu1 %v1158_v0  ;;  %684 = vmatpush1.msra.mxu0 %v1328_v33  ;;  %v636_v25 = vld [vmem:[#allocation3 + $0x158] sm:$0xff] }
  0x2d   :  { %1014 = vmatmul.mubr.msk.f32.gmra.mxu0 %vm92_vm2, %v72_v34  ;;  %685 = vmatprep.subr.mxu0 %v1335_v35  ;;  %v627_v34 = vld [vmem:[#allocation3 + $0x110] sm:$0xff] }
  0x2e   :  { %252 = vmatprep.mubr.f32.mxu0 %v1158_v0  ;;  %686 = vmatpush1.msra.mxu0 %v1339_v36 }
  0x2f   :  { %1031 = vmatmul.mubr.msk.f32.gmra.mxu1 %vm307_vm1, %v55_v37  ;;  %687 = vmatprep.subr.mxu0 %v1346_v38  ;;  %v519_v37 = vlaneseq }
  0x30   :  { %468 = vmatprep.mubr.f32.mxu1 %v1158_v0  ;;  %688 = vmatpush1.msra.mxu0 %v1350_v39 }
  0x31   :  { %1015 = vmatmul.mubr.msk.f32.gmra.mxu0 %vm92_vm2, %v73_v40  ;;  %689 = vmatprep.subr.mxu0 %v1357_v41  ;;  %v517_v40 = vld [vmem:[%s1717_s4] sm:$0x3] }
  0x32   :  { %258 = vmatprep.mubr.f32.mxu0 %v1158_v0  ;;  %690 = vmatpush1.msra.mxu0 %v1361_v42 }
  0x33   :  { %1032 = vmatmul.mubr.msk.f32.gmra.mxu1 %vm307_vm1, %v56_v43  ;;  %691 = vmatprep.subr.mxu0 %v1368_v44 }
  0x34   :  { %474 = vmatprep.mubr.f32.mxu1 %v1158_v0  ;;  %692 = vmatpush1.msra.mxu0 %v1372_v45 }
  0x35   :  { %1016 = vmatmul.mubr.msk.f32.gmra.mxu0 %vm92_vm2, %v74_v46  ;;  %693 = vmatprep.subr.mxu0 %v1379_v47 }
  0x36   :  { %264 = vmatprep.mubr.f32.mxu0 %v1158_v0  ;;  %694 = vmatpush1.msra.mxu0 %v1383_v48 }
  0x37   :  { %1033 = vmatmul.mubr.msk.f32.gmra.mxu1 %vm307_vm1, %v57_v49  ;;  %695 = vmatprep.subr.mxu0 %v1390_v50 }
  0x38   :  { %480 = vmatprep.mubr.f32.mxu1 %v1158_v0  ;;  %696 = vmatpush1.msra.mxu0 %v1394_v51 }
  0x39   :  { %1017 = vmatmul.mubr.msk.f32.gmra.mxu0 %vm92_vm2, %v75_v52  ;;  %697 = vmatprep.subr.mxu0 %v1401_v53 }
  0x3a   :  { %270 = vmatprep.mubr.f32.mxu0 %v1158_v0  ;;  %698 = vmatpush1.msra.mxu0 %v1405_v54 }
  0x3b   :  { %1034 = vmatmul.mubr.msk.f32.gmra.mxu1 %vm307_vm1, %v58_v55  ;;  %699 = vmatprep.subr.mxu0 %v1412_v56 }
  0x3c   :  { %486 = vmatprep.mubr.f32.mxu1 %v1158_v0  ;;  %700 = vmatpush1.msra.mxu0 %v1416_v57 }
  0x3d   :  { %1018 = vmatmul.mubr.msk.f32.gmra.mxu0 %vm92_vm2, %v76_v58  ;;  %701 = vmatprep.subr.mxu0 %v1425_v59 }
  0x3e   :  { %276 = vmatprep.mubr.f32.mxu0 %v1158_v0  ;;  %702 = vmatpush2.msra.mxu0 %v1434_v61 }
  0x3f   :  { %1035 = vmatmul.mubr.msk.f32.gmra.mxu1 %vm307_vm1, %v59_v60  ;;  %703 = vmatprep.subr.mxu0 %v1443_v63 }
  0x40   :  { %492 = vmatprep.mubr.f32.mxu1 %v1158_v0  ;;  %704 = vmatpush2.msra.mxu0 %v1452_v2 }
  0x41   :  { %1019 = vmatmul.mubr.msk.f32.gmra.mxu0 %vm92_vm2, %v77_v62  ;;  %705 = vmatprep.subr.mxu0 %v1461_v4 }
  0x42   :  { %282 = vmatprep.mubr.f32.mxu0 %v1158_v0  ;;  %706 = vmatpush2.msra.mxu0 %v1470_v6 }
  0x43   :  { %1036 = vmatmul.mubr.msk.f32.gmra.mxu1 %vm307_vm1, %v60_v1  ;;  %707 = vmatprep.subr.mxu0 %v1479_v8 }
  0x44   :  { %498 = vmatprep.mubr.f32.mxu1 %v1158_v0  ;;  %708 = vmatpush2.msra.mxu0 %v1488_v10 }
  0x45   :  { %1020 = vmatmul.mubr.msk.f32.gmra.mxu0 %vm92_vm2, %v78_v3  ;;  %709 = vmatprep.subr.mxu0 %v1497_v12 }
  0x46   :  { %288 = vmatprep.mubr.f32.mxu0 %v1158_v0  ;;  %1045 = vmatprep.subr.mxu1 %v1302_v26  ;;  %v635_v26 = vld [vmem:[#allocation3 + $0x150] sm:$0xff] }
  0x47   :  { %1037 = vmatmul.mubr.msk.f32.gmra.mxu1 %vm307_vm1, %v61_v5  ;;  %710 = vmatpush2.msra.mxu0 %v1506_v14 }
  0x48   :  { %504 = vmatprep.mubr.f32.mxu1 %v1158_v0  ;;  %1077 = vmatpush1.msra.mxu1 %v1306_v27  ;;  %v634_v27 = vld [vmem:[#allocation3 + $0x148] sm:$0xff] }
  0x49   :  { %1021 = vmatmul.mubr.msk.f32.gmra.mxu0 %vm92_vm2, %v79_v7  ;;  %711 = vmatprep.subr.mxu0 %v1513_v16 }
  0x4a   :  { %294 = vmatprep.mubr.f32.mxu0 %v1158_v0  ;;  %1046 = vmatprep.subr.mxu1 %v1313_v29  ;;  %v632_v29 = vld [vmem:[#allocation3 + $0x138] sm:$0xff] }
  0x4b   :  { %1038 = vmatmul.mubr.msk.f32.gmra.mxu1 %vm307_vm1, %v62_v9  ;;  %712 = vmatpush2.msra.mxu0 %v1517_v17 }
  0x4c   :  { %510 = vmatprep.mubr.f32.mxu1 %v1158_v0  ;;  %1078 = vmatpush1.msra.mxu1 %v1317_v30  ;;  %v631_v30 = vld [vmem:[#allocation3 + $0x130] sm:$0xff] }
  0x4d   :  { %1022 = vmatmul.mubr.msk.f32.gmra.mxu0 %vm92_vm2, %v80_v11  ;;  %713 = vmatprep.subr.mxu0 %v1521_v18 }
  0x4e   :  { %300 = vmatprep.mubr.f32.mxu0 %v1158_v0  ;;  %v1525_v0 = vld [vmem:[#allocation3 + $0x190] sm:$0xff]  ;;  %1047 = vmatprep.subr.mxu1 %v1324_v32  ;;  %v629_v32 = vld [vmem:[#allocation3 + $0x120] sm:$0xff] }
  0x4f   :  { %1039 = vmatmul.mubr.msk.f32.gmra.mxu1 %vm307_vm1, %v63_v13  ;;  %714 = vmatpush2.msra.mxu0 %v1525_v0 }
  0x50   :  { %1079 = vmatpush1.msra.mxu1 %v1328_v33  ;;  %715 = vmatprep.subr.mxu0 %v1529_v19  ;;  %v628_v33 = vld [vmem:[#allocation3 + $0x118] sm:$0xff] }
  0x51   :  { %1023 = vmatmul.mubr.msk.f32.gmra.mxu0 %vm92_vm2, %v81_v15  ;;  %1048 = vmatprep.subr.mxu1 %v1335_v35  ;;  %v626_v35 = vld [vmem:[#allocation3 + $0x108] sm:$0xff] }
  0x52   :  { %716 = vmatpush2.msra.mxu0 %v1533_v20  ;;  %1080 = vmatpush1.msra.mxu1 %v1339_v36  ;;  %v625_v36 = vld [vmem:[#allocation3 + $0x100] sm:$0xff] }
  0x53   :  { %717 = vmatprep.subr.mxu0 %v1537_v21  ;;  %1049 = vmatprep.subr.mxu1 %v1346_v38  ;;  %v520_v38 = vshrl.u32 %v519_v37, 7 }
  0x54   :  { %718 = vmatpush2.msra.mxu0 %v1541_v22  ;;  %1081 = vmatpush1.msra.mxu1 %v1350_v39 }
  0x55   :  { %719 = vmatprep.subr.mxu0 %v638_v23  ;;  %1050 = vmatprep.subr.mxu1 %v1357_v41  ;;  %v1580_v39 = vsub.s32 0, %v520_v38  ;;  %v1585_v41 = vsub.s32 1, %v520_v38 }
  0x56   :  { %720 = vmatpush2.msra.mxu0 %v637_v24  ;;  %1082 = vmatpush1.msra.mxu1 %v1361_v42 }
  0x57   :  { %721 = vmatprep.subr.mxu0 %v636_v25  ;;  %1051 = vmatprep.subr.mxu1 %v1368_v44  ;;  %v1588_v44 = vrot.slane %v517_v40, %v1580_v39 }
  0x58   :  { %722 = vmatpush2.msra.mxu0 %v635_v26  ;;  %1083 = vmatpush1.msra.mxu1 %v1372_v45 }
  0x59   :  { %723 = vmatprep.subr.mxu0 %v634_v27  ;;  %1052 = vmatprep.subr.mxu1 %v1379_v47  ;;  %v1591_v47 = vrot.slane %v517_v40, %v1585_v41 }
  0x5a   :  { %724 = vmatpush2.msra.mxu0 %v633_v28  ;;  %1084 = vmatpush1.msra.mxu1 %v1383_v48 }
  0x5b   :  { %725 = vmatprep.subr.mxu0 %v632_v29  ;;  %1053 = vmatprep.subr.mxu1 %v1390_v50 }
  0x5c   :  { %726 = vmatpush2.msra.mxu0 %v631_v30  ;;  %1085 = vmatpush1.msra.mxu1 %v1394_v51 }
  0x5d   :  { %727 = vmatprep.subr.mxu0 %v630_v31  ;;  %1054 = vmatprep.subr.mxu1 %v1401_v53 }
  0x5e   :  { %728 = vmatpush2.msra.mxu0 %v629_v32  ;;  %1086 = vmatpush1.msra.mxu1 %v1405_v54 }
  0x5f   :  { %729 = vmatprep.subr.mxu0 %v628_v33  ;;  %1055 = vmatprep.subr.mxu1 %v1412_v56 }
  0x60   :  { %730 = vmatpush2.msra.mxu0 %v627_v34  ;;  %1087 = vmatpush1.msra.mxu1 %v1416_v57 }
  0x61   :  { %731 = vmatprep.subr.mxu0 %v626_v35  ;;  %1056 = vmatprep.subr.mxu1 %v1425_v59 }
  0x62   :  { %732 = vmatpush2.msra.mxu0 %v625_v36  ;;  %1088 = vmatpush2.msra.mxu1 %v1434_v61 }
  0x63   :  { %1057 = vmatprep.subr.mxu1 %v1443_v63 }
  0x64   :  { %1089 = vmatpush2.msra.mxu1 %v1452_v2 }
  0x65   :  { %1058 = vmatprep.subr.mxu1 %v1461_v4 }
  0x66   :  { %1090 = vmatpush2.msra.mxu1 %v1470_v6 }
  0x67   :  { %1059 = vmatprep.subr.mxu1 %v1479_v8 }
  0x68   :  { %1091 = vmatpush2.msra.mxu1 %v1488_v10 }
  0x69   :  { %1060 = vmatprep.subr.mxu1 %v1497_v12 }
  0x6a   :  { %1092 = vmatpush2.msra.mxu1 %v1506_v14 }
  0x6b   :  { %1061 = vmatprep.subr.mxu1 %v1513_v16 }
  0x6c   :  { %1093 = vmatpush2.msra.mxu1 %v1517_v17 }
  0x6d   :  { %1062 = vmatprep.subr.mxu1 %v1521_v18 }
  0x6e   :  { %1094 = vmatpush2.msra.mxu1 %v1525_v0 }
  0x6f   :  { %1063 = vmatprep.subr.mxu1 %v1529_v19 }
  0x70   :  { %1095 = vmatpush2.msra.mxu1 %v1533_v20 }
  0x71   :  { %1064 = vmatprep.subr.mxu1 %v1537_v21 }
  0x72   :  { %1096 = vmatpush2.msra.mxu1 %v1541_v22 }
  0x73   :  { %1065 = vmatprep.subr.mxu1 %v638_v23 }
  0x74   :  { %1097 = vmatpush2.msra.mxu1 %v637_v24 }
  0x75   :  { %1066 = vmatprep.subr.mxu1 %v636_v25 }
  0x76   :  { %1098 = vmatpush2.msra.mxu1 %v635_v26 }
  0x77   :  { %1067 = vmatprep.subr.mxu1 %v634_v27 }
  0x78   :  { %1099 = vmatpush2.msra.mxu1 %v633_v28 }
  0x79   :  { %1068 = vmatprep.subr.mxu1 %v632_v29 }
  0x7a   :  { %1100 = vmatpush2.msra.mxu1 %v631_v30 }
  0x7b   :  { %1069 = vmatprep.subr.mxu1 %v630_v31 }
  0x7c   :  { %1101 = vmatpush2.msra.mxu1 %v629_v32 }
  0x7d   :  { %1070 = vmatprep.subr.mxu1 %v628_v33 }
  0x7e   :  { %1102 = vmatpush2.msra.mxu1 %v627_v34 }
  0x7f   :  { %1071 = vmatprep.subr.mxu1 %v626_v35 }
  0x80   :  { %1103 = vmatpush2.msra.mxu1 %v625_v36 }
  0xd2   :  { %v422_v42 = vpop.f32.mrf.mxu1 }
  0xd4   :  { %v424_v45 = vpop.f32.mrf.mxu1 }
  0xd5   :  { %v212_v43 = vpop.f32.mrf.mxu0 }
  0xd6   :  { %v423_v46 = vadd.f32 %v422_v42, %v212_v43  ;;  %v428_v49 = vpop.f32.mrf.mxu1 }
  0xd7   :  { %v214_v48 = vpop.f32.mrf.mxu0 }
  0xd8   :  { %v425_v50 = vadd.f32 %v424_v45, %v214_v48  ;;  %v529_v51 = vadd.f32 %v1588_v44, %v423_v46  ;;  %v430_v53 = vpop.f32.mrf.mxu1 }
  0xd9   :  { %v218_v52 = vpop.f32.mrf.mxu0 }
  0xda   :  { %v530_v54 = vadd.f32 %v1591_v47, %v425_v50  ;;  %v429_v55 = vadd.f32 %v428_v49, %v218_v52  ;;  %v434_v57 = vpop.f32.mrf.mxu1  ;;  %v561_v60 = vmax.f32 %v529_v51, 0.0 }
  0xdb   :  { %v220_v56 = vpop.f32.mrf.mxu0 }
  0xdc   :  { %v562_v58 = vmax.f32 %v530_v54, 0.0  ;;  %v431_v59 = vadd.f32 %v430_v53, %v220_v56  ;;  %v531_v61 = vadd.f32 %v1588_v44, %v429_v55  ;;  %v436_v63 = vpop.f32.mrf.mxu1 }
  0xdd   :  { %v224_v62 = vpop.f32.mrf.mxu0 }
  0xde   :  { %v532_v1 = vadd.f32 %v1591_v47, %v431_v59  ;;  %v435_v2 = vadd.f32 %v434_v57, %v224_v62  ;;  %733 = vmatprep.mubr.f32.mxu0 %v562_v58  ;;  %v440_v4 = vpop.f32.mrf.mxu1  ;;  %v563_v7 = vmax.f32 %v531_v61, 0.0 }
  0xdf   :  { %v226_v3 = vpop.f32.mrf.mxu0  ;;  %734 = vmatmul.mubr.f32.vlgmr.msra.gmra.mxu0 %v561_v60 }
  0xe0   :  { %v564_v5 = vmax.f32 %v532_v1, 0.0  ;;  %v437_v6 = vadd.f32 %v436_v63, %v226_v3  ;;  %v533_v8 = vadd.f32 %v1588_v44, %v435_v2  ;;  %v442_v10 = vpop.f32.mrf.mxu1 }
  0xe1   :  { %v230_v9 = vpop.f32.mrf.mxu0 }
  0xe2   :  { %v534_v11 = vadd.f32 %v1591_v47, %v437_v6  ;;  %v441_v12 = vadd.f32 %v440_v4, %v230_v9  ;;  %739 = vmatprep.mubr.f32.mxu0 %v564_v5  ;;  %v446_v14 = vpop.f32.mrf.mxu1  ;;  %v565_v17 = vmax.f32 %v533_v8, 0.0 }
  0xe3   :  { %v232_v13 = vpop.f32.mrf.mxu0  ;;  %740 = vmatmul.mubr.f32.gmra.mxu0 %v563_v7 }
  0xe4   :  { %v566_v15 = vmax.f32 %v534_v11, 0.0  ;;  %v443_v16 = vadd.f32 %v442_v10, %v232_v13  ;;  %v535_v18 = vadd.f32 %v1588_v44, %v441_v12  ;;  %v448_v19 = vpop.f32.mrf.mxu1 }
  0xe5   :  { %v236_v0 = vpop.f32.mrf.mxu0 }
  0xe6   :  { %v536_v20 = vadd.f32 %v1591_v47, %v443_v16  ;;  %v447_v21 = vadd.f32 %v446_v14, %v236_v0  ;;  %745 = vmatprep.mubr.f32.mxu0 %v566_v15  ;;  %v567_v26 = vmax.f32 %v535_v18, 0.0 }
  0xe7   :  { %v238_v22 = vpop.f32.mrf.mxu0  ;;  %v452_v23 = vpop.f32.mrf.mxu1  ;;  %746 = vmatmul.mubr.f32.gmra.mxu0 %v565_v17 }
  0xe8   :  { %v568_v24 = vmax.f32 %v536_v20, 0.0  ;;  %v449_v25 = vadd.f32 %v448_v19, %v238_v22  ;;  %v537_v27 = vadd.f32 %v1588_v44, %v447_v21 }
  0xe9   :  { %v242_v28 = vpop.f32.mrf.mxu0  ;;  %v454_v29 = vpop.f32.mrf.mxu1 }
  0xea   :  { %v538_v30 = vadd.f32 %v1591_v47, %v449_v25  ;;  %v453_v31 = vadd.f32 %v452_v23, %v242_v28  ;;  %751 = vmatprep.mubr.f32.mxu0 %v568_v24  ;;  %v569_v36 = vmax.f32 %v537_v27, 0.0 }
  0xeb   :  { %v244_v32 = vpop.f32.mrf.mxu0  ;;  %v458_v33 = vpop.f32.mrf.mxu1  ;;  %752 = vmatmul.mubr.f32.gmra.mxu0 %v567_v26 }
  0xec   :  { %v570_v34 = vmax.f32 %v538_v30, 0.0  ;;  %v455_v35 = vadd.f32 %v454_v29, %v244_v32  ;;  %v539_v37 = vadd.f32 %v1588_v44, %v453_v31 }
  0xed   :  { %v248_v38 = vpop.f32.mrf.mxu0  ;;  %v460_v40 = vpop.f32.mrf.mxu1 }
  0xee   :  { %v540_v42 = vadd.f32 %v1591_v47, %v455_v35  ;;  %v459_v43 = vadd.f32 %v458_v33, %v248_v38  ;;  %757 = vmatprep.mubr.f32.mxu0 %v570_v34  ;;  %v571_v50 = vmax.f32 %v539_v37, 0.0 }
  0xef   :  { %v250_v45 = vpop.f32.mrf.mxu0  ;;  %v464_v46 = vpop.f32.mrf.mxu1  ;;  %758 = vmatmul.mubr.f32.gmra.mxu0 %v569_v36 }
  0xf0   :  { %v572_v48 = vmax.f32 %v540_v42, 0.0  ;;  %v461_v49 = vadd.f32 %v460_v40, %v250_v45  ;;  %v541_v51 = vadd.f32 %v1588_v44, %v459_v43 }
  0xf1   :  { %v254_v52 = vpop.f32.mrf.mxu0  ;;  %v466_v53 = vpop.f32.mrf.mxu1 }
  0xf2   :  { %v542_v54 = vadd.f32 %v1591_v47, %v461_v49  ;;  %v465_v55 = vadd.f32 %v464_v46, %v254_v52  ;;  %763 = vmatprep.mubr.f32.mxu0 %v572_v48  ;;  %v573_v60 = vmax.f32 %v541_v51, 0.0 }
  0xf3   :  { %v256_v56 = vpop.f32.mrf.mxu0  ;;  %v470_v57 = vpop.f32.mrf.mxu1  ;;  %764 = vmatmul.mubr.f32.gmra.mxu0 %v571_v50 }
  0xf4   :  { %v574_v58 = vmax.f32 %v542_v54, 0.0  ;;  %v467_v59 = vadd.f32 %v466_v53, %v256_v56  ;;  %v543_v61 = vadd.f32 %v1588_v44, %v465_v55 }
  0xf5   :  { %v260_v62 = vpop.f32.mrf.mxu0  ;;  %v472_v63 = vpop.f32.mrf.mxu1 }
  0xf6   :  { %v544_v1 = vadd.f32 %v1591_v47, %v467_v59  ;;  %v471_v2 = vadd.f32 %v470_v57, %v260_v62  ;;  %769 = vmatprep.mubr.f32.mxu0 %v574_v58  ;;  %v575_v7 = vmax.f32 %v543_v61, 0.0 }
  0xf7   :  { %v262_v3 = vpop.f32.mrf.mxu0  ;;  %v476_v4 = vpop.f32.mrf.mxu1  ;;  %770 = vmatmul.mubr.f32.gmra.mxu0 %v573_v60 }
  0xf8   :  { %v576_v5 = vmax.f32 %v544_v1, 0.0  ;;  %v473_v6 = vadd.f32 %v472_v63, %v262_v3  ;;  %v545_v8 = vadd.f32 %v1588_v44, %v471_v2 }
  0xf9   :  { %v266_v9 = vpop.f32.mrf.mxu0  ;;  %v478_v10 = vpop.f32.mrf.mxu1 }
  0xfa   :  { %v546_v11 = vadd.f32 %v1591_v47, %v473_v6  ;;  %v477_v12 = vadd.f32 %v476_v4, %v266_v9  ;;  %775 = vmatprep.mubr.f32.mxu0 %v576_v5  ;;  %v577_v17 = vmax.f32 %v545_v8, 0.0 }
  0xfb   :  { %v268_v13 = vpop.f32.mrf.mxu0  ;;  %v482_v14 = vpop.f32.mrf.mxu1  ;;  %776 = vmatmul.mubr.f32.gmra.mxu0 %v575_v7 }
  0xfc   :  { %v578_v15 = vmax.f32 %v546_v11, 0.0  ;;  %v479_v16 = vadd.f32 %v478_v10, %v268_v13  ;;  %v547_v18 = vadd.f32 %v1588_v44, %v477_v12 }
  0xfd   :  { %v272_v0 = vpop.f32.mrf.mxu0  ;;  %v484_v19 = vpop.f32.mrf.mxu1 }
  0xfe   :  { %v548_v20 = vadd.f32 %v1591_v47, %v479_v16  ;;  %v483_v21 = vadd.f32 %v482_v14, %v272_v0  ;;  %781 = vmatprep.mubr.f32.mxu1 %v578_v15  ;;  %v579_v26 = vmax.f32 %v547_v18, 0.0 }
  0xff   :  { %v274_v22 = vpop.f32.mrf.mxu0  ;;  %v488_v23 = vpop.f32.mrf.mxu1  ;;  %782 = vmatmul.mubr.f32.vlgmr.msra.gmra.mxu1 %v577_v17 }
 0x100   :  { %v580_v24 = vmax.f32 %v548_v20, 0.0  ;;  %v485_v25 = vadd.f32 %v484_v19, %v274_v22  ;;  %v549_v27 = vadd.f32 %v1588_v44, %v483_v21  ;;  %v657_v20 = vld [vmem:[%s1719_s6] sm:$0x3] }
 0x101   :  { %v278_v28 = vpop.f32.mrf.mxu0  ;;  %v490_v29 = vpop.f32.mrf.mxu1  ;;  %v1629_v21 = vrot.slane %v657_v20, %v1580_v39  ;;  %v1632_v22 = vrot.slane %v657_v20, %v1585_v41 }
 0x102   :  { %v550_v30 = vadd.f32 %v1591_v47, %v485_v25  ;;  %v489_v31 = vadd.f32 %v488_v23, %v278_v28  ;;  %787 = vmatprep.mubr.f32.mxu1 %v580_v24  ;;  %v581_v36 = vmax.f32 %v549_v27, 0.0 }
 0x103   :  { %v280_v32 = vpop.f32.mrf.mxu0  ;;  %v494_v33 = vpop.f32.mrf.mxu1  ;;  %788 = vmatmul.mubr.f32.gmra.mxu1 %v579_v26 }
 0x104   :  { %v582_v34 = vmax.f32 %v550_v30, 0.0  ;;  %v491_v35 = vadd.f32 %v490_v29, %v280_v32  ;;  %v551_v37 = vadd.f32 %v1588_v44, %v489_v31 }
 0x105   :  { %v284_v38 = vpop.f32.mrf.mxu0  ;;  %v496_v40 = vpop.f32.mrf.mxu1 }
 0x106   :  { %v552_v42 = vadd.f32 %v1591_v47, %v491_v35  ;;  %v495_v43 = vadd.f32 %v494_v33, %v284_v38  ;;  %793 = vmatprep.mubr.f32.mxu1 %v582_v34  ;;  %v583_v50 = vmax.f32 %v551_v37, 0.0 }
 0x107   :  { %v286_v45 = vpop.f32.mrf.mxu0  ;;  %v500_v46 = vpop.f32.mrf.mxu1  ;;  %794 = vmatmul.mubr.f32.gmra.mxu1 %v581_v36 }
 0x108   :  { %v584_v48 = vmax.f32 %v552_v42, 0.0  ;;  %v497_v49 = vadd.f32 %v496_v40, %v286_v45  ;;  %v553_v51 = vadd.f32 %v1588_v44, %v495_v43 }
 0x109   :  { %v290_v52 = vpop.f32.mrf.mxu0  ;;  %v502_v53 = vpop.f32.mrf.mxu1 }
 0x10a   :  { %v554_v54 = vadd.f32 %v1591_v47, %v497_v49  ;;  %v501_v55 = vadd.f32 %v500_v46, %v290_v52  ;;  %799 = vmatprep.mubr.f32.mxu1 %v584_v48  ;;  %v585_v60 = vmax.f32 %v553_v51, 0.0 }
 0x10b   :  { %v292_v56 = vpop.f32.mrf.mxu0  ;;  %v506_v57 = vpop.f32.mrf.mxu1  ;;  %800 = vmatmul.mubr.f32.gmra.mxu1 %v583_v50 }
 0x10c   :  { %v586_v58 = vmax.f32 %v554_v54, 0.0  ;;  %v503_v59 = vadd.f32 %v502_v53, %v292_v56  ;;  %v555_v61 = vadd.f32 %v1588_v44, %v501_v55 }
 0x10d   :  { %v296_v62 = vpop.f32.mrf.mxu0  ;;  %v508_v63 = vpop.f32.mrf.mxu1 }
 0x10e   :  { %v556_v1 = vadd.f32 %v1591_v47, %v503_v59  ;;  %v507_v2 = vadd.f32 %v506_v57, %v296_v62  ;;  %805 = vmatprep.mubr.f32.mxu1 %v586_v58  ;;  %v587_v7 = vmax.f32 %v555_v61, 0.0 }
 0x10f   :  { %v298_v3 = vpop.f32.mrf.mxu0  ;;  %v512_v4 = vpop.f32.mrf.mxu1  ;;  %806 = vmatmul.mubr.f32.gmra.mxu1 %v585_v60 }
 0x110   :  { %v588_v5 = vmax.f32 %v556_v1, 0.0  ;;  %v509_v6 = vadd.f32 %v508_v63, %v298_v3  ;;  %v557_v8 = vadd.f32 %v1588_v44, %v507_v2 }
 0x111   :  { %v302_v9 = vpop.f32.mrf.mxu0  ;;  %v514_v12 = vpop.f32.mrf.mxu1 }
 0x112   :  { %v558_v10 = vadd.f32 %v1591_v47, %v509_v6  ;;  %v513_v11 = vadd.f32 %v512_v4, %v302_v9  ;;  %811 = vmatprep.mubr.f32.mxu1 %v588_v5  ;;  %v589_v16 = vmax.f32 %v557_v8, 0.0 }
 0x113   :  { %v304_v13 = vpop.f32.mrf.mxu0  ;;  %812 = vmatmul.mubr.f32.gmra.mxu1 %v587_v7 }
 0x114   :  { %v590_v14 = vmax.f32 %v558_v10, 0.0  ;;  %v515_v15 = vadd.f32 %v514_v12, %v304_v13  ;;  %v559_v17 = vadd.f32 %v1588_v44, %v513_v11  ;;  %v862_v44 = vld [vmem:[%s1720_s7] sm:$0x3] }
 0x115   :  { %v1640_v27 = vrot.slane %v862_v44, %v1580_v39  ;;  %v1643_v28 = vrot.slane %v862_v44, %v1585_v41 }
 0x116   :  { %v560_v18 = vadd.f32 %v1591_v47, %v515_v15  ;;  %817 = vmatprep.mubr.f32.mxu1 %v590_v14  ;;  %v591_v19 = vmax.f32 %v559_v17, 0.0 }
 0x117   :  { %818 = vmatmul.mubr.f32.gmra.mxu1 %v589_v16 }
 0x118   :  { %v592_v0 = vmax.f32 %v560_v18, 0.0 }
 0x11a   :  { %823 = vmatprep.mubr.f32.mxu1 %v592_v0 }
 0x11b   :  { %824 = vmatmul.mubr.f32.gmra.mxu1 %v591_v19 }
 0x19f   :  { %v735_v23 = vpop.f32.mrf.mxu0 }
 0x1a0   :  { %v736_v47 = vadd.f32 %v735_v23, %v1629_v21 }
 0x1a1   :  { %v737_v24 = vpop.f32.mrf.mxu0 }
 0x1a2   :  { %v830_v25 = vmax.f32 %v736_v47, 0.0  ;;  %v738_v26 = vadd.f32 %v737_v24, %v1632_v22 }
 0x1a3   :  { %v741_v29 = vpop.f32.mrf.mxu0 }
 0x1a4   :  { %v831_v30 = vmax.f32 %v738_v26, 0.0  ;;  %v742_v31 = vadd.f32 %v741_v29, %v1629_v21  ;;  %v874_v35 = vmul.f32 %v1640_v27, %v830_v25 }
 0x1a5   :  { %v743_v32 = vpop.f32.mrf.mxu0 }
 0x1a6   :  { %v832_v33 = vmax.f32 %v742_v31, 0.0  ;;  %v744_v34 = vadd.f32 %v743_v32, %v1632_v22  ;;  %v875_v36 = vmul.f32 %v1643_v28, %v831_v30 }
 0x1a7   :  { %v747_v37 = vpop.f32.mrf.mxu0 }
 0x1a8   :  { %v833_v38 = vmax.f32 %v744_v34, 0.0  ;;  %v748_v39 = vadd.f32 %v747_v37, %v1629_v21  ;;  %v906_v40 = vadd.f32 %v875_v36, %v874_v35  ;;  %v876_v41 = vmul.f32 %v1640_v27, %v832_v33 }
 0x1a9   :  { %v749_v42 = vpop.f32.mrf.mxu0 }
 0x1aa   :  { %v877_v43 = vmul.f32 %v1643_v28, %v833_v38  ;;  %v834_v45 = vmax.f32 %v748_v39, 0.0  ;;  %v750_v46 = vadd.f32 %v749_v42, %v1632_v22  ;;  %907 = vadd.xlane.f32.xlu0 %v906_v40 }
 0x1ab   :  { %v753_v48 = vpop.f32.mrf.mxu0 }
 0x1ac   :  { %v835_v49 = vmax.f32 %v750_v46, 0.0  ;;  %v754_v50 = vadd.f32 %v753_v48, %v1629_v21  ;;  %v909_v51 = vadd.f32 %v877_v43, %v876_v41  ;;  %v878_v55 = vmul.f32 %v1640_v27, %v834_v45 }
 0x1ad   :  { %v755_v52 = vpop.f32.mrf.mxu0 }
 0x1ae   :  { %v836_v53 = vmax.f32 %v754_v50, 0.0  ;;  %v756_v54 = vadd.f32 %v755_v52, %v1632_v22  ;;  %910 = vadd.xlane.f32.xlu0 %v909_v51  ;;  %v879_v56 = vmul.f32 %v1643_v28, %v835_v49 }
 0x1af   :  { %v759_v57 = vpop.f32.mrf.mxu0 }
 0x1b0   :  { %v837_v58 = vmax.f32 %v756_v54, 0.0  ;;  %v760_v59 = vadd.f32 %v759_v57, %v1629_v21  ;;  %v912_v60 = vadd.f32 %v879_v56, %v878_v55  ;;  %v880_v62 = vmul.f32 %v1640_v27, %v836_v53 }
 0x1b1   :  { %v761_v61 = vpop.f32.mrf.mxu0 }
 0x1b2   :  { %v881_v63 = vmul.f32 %v1643_v28, %v837_v58  ;;  %v838_v1 = vmax.f32 %v760_v59, 0.0  ;;  %v762_v2 = vadd.f32 %v761_v61, %v1632_v22  ;;  %913 = vadd.xlane.f32.xlu1 %v912_v60 }
 0x1b3   :  { %v765_v3 = vpop.f32.mrf.mxu0 }
 0x1b4   :  { %v839_v4 = vmax.f32 %v762_v2, 0.0  ;;  %v766_v5 = vadd.f32 %v765_v3, %v1629_v21  ;;  %v915_v6 = vadd.f32 %v881_v63, %v880_v62  ;;  %v882_v8 = vmul.f32 %v1640_v27, %v838_v1 }
 0x1b5   :  { %v767_v7 = vpop.f32.mrf.mxu0 }
 0x1b6   :  { %v883_v9 = vmul.f32 %v1643_v28, %v839_v4  ;;  %v840_v10 = vmax.f32 %v766_v5, 0.0  ;;  %v768_v11 = vadd.f32 %v767_v7, %v1632_v22  ;;  %916 = vadd.xlane.f32.xlu1 %v915_v6 }
 0x1b7   :  { %v771_v12 = vpop.f32.mrf.mxu0 }
 0x1b8   :  { %v841_v13 = vmax.f32 %v768_v11, 0.0  ;;  %v772_v14 = vadd.f32 %v771_v12, %v1629_v21  ;;  %v918_v15 = vadd.f32 %v883_v9, %v882_v8  ;;  %v884_v17 = vmul.f32 %v1640_v27, %v840_v10 }
 0x1b9   :  { %v773_v16 = vpop.f32.mrf.mxu0 }
 0x1ba   :  { %v885_v18 = vmul.f32 %v1643_v28, %v841_v13  ;;  %v842_v0 = vmax.f32 %v772_v14, 0.0  ;;  %v774_v19 = vadd.f32 %v773_v16, %v1632_v22  ;;  %919 = vadd.xlane.f32.xlu0 %v918_v15 }
 0x1bb   :  { %v777_v20 = vpop.f32.mrf.mxu0 }
 0x1bc   :  { %v843_v23 = vmax.f32 %v774_v19, 0.0  ;;  %v778_v44 = vadd.f32 %v777_v20, %v1629_v21  ;;  %v921_v47 = vadd.f32 %v885_v18, %v884_v17  ;;  %v886_v25 = vmul.f32 %v1640_v27, %v842_v0 }
 0x1bd   :  { %v779_v24 = vpop.f32.mrf.mxu0 }
 0x1be   :  { %v887_v26 = vmul.f32 %v1643_v28, %v843_v23  ;;  %v844_v29 = vmax.f32 %v778_v44, 0.0  ;;  %v780_v30 = vadd.f32 %v779_v24, %v1632_v22  ;;  %922 = vadd.xlane.f32.xlu1 %v921_v47 }
 0x1bf   :  { %v783_v31 = vpop.f32.mrf.mxu1 }
 0x1c0   :  { %v845_v32 = vmax.f32 %v780_v30, 0.0  ;;  %v784_v33 = vadd.f32 %v783_v31, %v1629_v21  ;;  %v924_v34 = vadd.f32 %v887_v26, %v886_v25  ;;  %v888_v36 = vmul.f32 %v1640_v27, %v844_v29 }
 0x1c1   :  { %v785_v35 = vpop.f32.mrf.mxu1 }
 0x1c2   :  { %v889_v37 = vmul.f32 %v1643_v28, %v845_v32  ;;  %v846_v38 = vmax.f32 %v784_v33, 0.0  ;;  %v786_v39 = vadd.f32 %v785_v35, %v1632_v22  ;;  %925 = vadd.xlane.f32.xlu0 %v924_v34 }
 0x1c3   :  { %v789_v40 = vpop.f32.mrf.mxu1 }
 0x1c4   :  { %v847_v42 = vmax.f32 %v786_v39, 0.0  ;;  %v790_v41 = vadd.f32 %v789_v40, %v1629_v21  ;;  %v927_v43 = vadd.f32 %v889_v37, %v888_v36  ;;  %v890_v46 = vmul.f32 %v1640_v27, %v846_v38 }
 0x1c5   :  { %v791_v45 = vpop.f32.mrf.mxu1 }
 0x1c6   :  { %v891_v48 = vmul.f32 %v1643_v28, %v847_v42  ;;  %v848_v49 = vmax.f32 %v790_v41, 0.0  ;;  %v792_v50 = vadd.f32 %v791_v45, %v1632_v22  ;;  %928 = vadd.xlane.f32.xlu1 %v927_v43 }
 0x1c7   :  { %v795_v51 = vpop.f32.mrf.mxu1 }
 0x1c8   :  { %v849_v52 = vmax.f32 %v792_v50, 0.0  ;;  %v796_v53 = vadd.f32 %v795_v51, %v1629_v21  ;;  %v930_v54 = vadd.f32 %v891_v48, %v890_v46  ;;  %v892_v56 = vmul.f32 %v1640_v27, %v848_v49 }
 0x1c9   :  { %v797_v55 = vpop.f32.mrf.mxu1 }
 0x1ca   :  { %v893_v57 = vmul.f32 %v1643_v28, %v849_v52  ;;  %v850_v58 = vmax.f32 %v796_v53, 0.0  ;;  %v798_v59 = vadd.f32 %v797_v55, %v1632_v22  ;;  %931 = vadd.xlane.f32.xlu0 %v930_v54 }
 0x1cb   :  { %v801_v60 = vpop.f32.mrf.mxu1 }
 0x1cc   :  { %v851_v61 = vmax.f32 %v798_v59, 0.0  ;;  %v802_v62 = vadd.f32 %v801_v60, %v1629_v21  ;;  %v933_v63 = vadd.f32 %v893_v57, %v892_v56  ;;  %v894_v2 = vmul.f32 %v1640_v27, %v850_v58 }
 0x1cd   :  { %v803_v1 = vpop.f32.mrf.mxu1 }
 0x1ce   :  { %v895_v3 = vmul.f32 %v1643_v28, %v851_v61  ;;  %v852_v4 = vmax.f32 %v802_v62, 0.0  ;;  %v804_v5 = vadd.f32 %v803_v1, %v1632_v22  ;;  %934 = vadd.xlane.f32.xlu1 %v933_v63 }
 0x1cf   :  { %v807_v6 = vpop.f32.mrf.mxu1 }
 0x1d0   :  { %v853_v7 = vmax.f32 %v804_v5, 0.0  ;;  %v808_v8 = vadd.f32 %v807_v6, %v1629_v21  ;;  %v936_v9 = vadd.f32 %v895_v3, %v894_v2  ;;  %v896_v11 = vmul.f32 %v1640_v27, %v852_v4 }
 0x1d1   :  { %v809_v10 = vpop.f32.mrf.mxu1 }
 0x1d2   :  { %v897_v12 = vmul.f32 %v1643_v28, %v853_v7  ;;  %v854_v13 = vmax.f32 %v808_v8, 0.0  ;;  %v810_v14 = vadd.f32 %v809_v10, %v1632_v22  ;;  %937 = vadd.xlane.f32.xlu0 %v936_v9 }
 0x1d3   :  { %v813_v15 = vpop.f32.mrf.mxu1 }
 0x1d4   :  { %v855_v16 = vmax.f32 %v810_v14, 0.0  ;;  %v814_v17 = vadd.f32 %v813_v15, %v1629_v21  ;;  %v939_v18 = vadd.f32 %v897_v12, %v896_v11  ;;  %v898_v19 = vmul.f32 %v1640_v27, %v854_v13 }
 0x1d5   :  { %v815_v0 = vpop.f32.mrf.mxu1 }
 0x1d6   :  { %v899_v20 = vmul.f32 %v1643_v28, %v855_v16  ;;  %v856_v23 = vmax.f32 %v814_v17, 0.0  ;;  %v816_v44 = vadd.f32 %v815_v0, %v1632_v22  ;;  %940 = vadd.xlane.f32.xlu1 %v939_v18 }
 0x1d7   :  { %v819_v47 = vpop.f32.mrf.mxu1 }
 0x1d8   :  { %v857_v24 = vmax.f32 %v816_v44, 0.0  ;;  %v820_v25 = vadd.f32 %v819_v47, %v1629_v21  ;;  %v942_v26 = vadd.f32 %v899_v20, %v898_v19  ;;  %v900_v30 = vmul.f32 %v1640_v27, %v856_v23 }
 0x1d9   :  { %v821_v29 = vpop.f32.mrf.mxu1 }
 0x1da   :  { %v901_v31 = vmul.f32 %v1643_v28, %v857_v24  ;;  %v858_v32 = vmax.f32 %v820_v25, 0.0  ;;  %v822_v33 = vadd.f32 %v821_v29, %v1632_v22  ;;  %943 = vadd.xlane.f32.xlu0 %v942_v26 }
 0x1db   :  { %v825_v34 = vpop.f32.mrf.mxu1 }
 0x1dc   :  { %v859_v35 = vmax.f32 %v822_v33, 0.0  ;;  %v826_v36 = vadd.f32 %v825_v34, %v1629_v21  ;;  %v945_v37 = vadd.f32 %v901_v31, %v900_v30  ;;  %v902_v39 = vmul.f32 %v1640_v27, %v858_v32 }
 0x1dd   :  { %v827_v38 = vpop.f32.mrf.mxu1  ;;  %v955_v21 = vstv %s1721_s8  ;;  %s1159_s8 = smov [#allocation6]  }
 0x1de   :  { %v903_v40 = vmul.f32 %v1643_v28, %v859_v35  ;;  %v860_v42 = vmax.f32 %v826_v36, 0.0  ;;  %v828_v41 = vadd.f32 %v827_v38, %v1632_v22  ;;  %946 = vadd.xlane.f32.xlu1 %v945_v37  ;;  %s993_s17 = sshll.u32 %s1159_s8, 4  ;;  %s994_s17 = int_to_ptr.vmem [resolvable:$true] %s993_s17 }
 0x1df   :  { %s1131_s18 = scalar_lea.vmem %s994_s17, 2048  ;;  %p1136_p6 = scmp.lt.s32.totalorder %s994_s17, %s994_s17 }
 0x1e0   :  { %v861_v43 = vmax.f32 %v828_v41, 0.0  ;;  %v948_v45 = vadd.f32 %v903_v40, %v902_v39  ;;  %v904_v46 = vmul.f32 %v1640_v27, %v860_v42  ;;  %p1132_p5 = scmp.ne.s32.totalorder %s994_s17, %s1131_s18  ;;  %p1137_p7 = scmp.lt.s32.totalorder %s1131_s18, %s1131_s18 }
 0x1e2   :  { %v905_v48 = vmul.f32 %v1643_v28, %v861_v43  ;;  %949 = vadd.xlane.f32.xlu0 %v948_v45  ;;  %p1138_p8 = por %p1137_p7, %p1136_p6 }
 0x1e4   :  { %v951_v49 = vadd.f32 %v905_v48, %v904_v46  ;;  %p1139_p9 = pnand %p1138_p8, %p1132_p5 }
 0x1e6   :  { %952 = vadd.xlane.f32.xlu1 %v951_v49 }
 0x233   :  { %v908_v50 = vpop.xlane.xlu0 %907 }
 0x234   :  { %v956_v51 = vadd.f32 %v955_v21, %v908_v50 }
 0x236   :  { %972 = vst [vmem:[#allocation6] sm:$0xff] %v956_v51 }
 0x237   :  { %v911_v52 = vpop.xlane.xlu0 %910 }
 0x238   :  { %v957_v53 = vadd.f32 %v955_v21, %v911_v52 }
 0x23a   :  { %973 = vst [vmem:[#allocation6 + $0x8] sm:$0xff] %v957_v53 }
 0x23b   :  { %v914_v22 = vpop.xlane.xlu1 %913 }
 0x23c   :  { %v958_v54 = vadd.f32 %v955_v21, %v914_v22 }
 0x23e   :  { %974 = vst [vmem:[#allocation6 + $0x10] sm:$0xff] %v958_v54 }
 0x23f   :  { %v917_v55 = vpop.xlane.xlu1 %916 }
 0x240   :  { %v959_v27 = vadd.f32 %v955_v21, %v917_v55 }
 0x242   :  { %975 = vst [vmem:[#allocation6 + $0x18] sm:$0xff] %v959_v27 }
 0x243   :  { %v920_v28 = vpop.xlane.xlu0 %919 }
 0x244   :  { %v960_v56 = vadd.f32 %v955_v21, %v920_v28 }
 0x246   :  { %976 = vst [vmem:[#allocation6 + $0x20] sm:$0xff] %v960_v56 }
 0x247   :  { %v923_v57 = vpop.xlane.xlu1 %922 }
 0x248   :  { %v961_v58 = vadd.f32 %v955_v21, %v923_v57 }
 0x24a   :  { %977 = vst [vmem:[#allocation6 + $0x28] sm:$0xff] %v961_v58 }
 0x24b   :  { %v926_v59 = vpop.xlane.xlu0 %925 }
 0x24c   :  { %v962_v60 = vadd.f32 %v955_v21, %v926_v59 }
 0x24e   :  { %978 = vst [vmem:[#allocation6 + $0x30] sm:$0xff] %v962_v60 }
 0x24f   :  { %v929_v61 = vpop.xlane.xlu1 %928 }
 0x250   :  { %v963_v62 = vadd.f32 %v955_v21, %v929_v61 }
 0x252   :  { %979 = vst [vmem:[#allocation6 + $0x38] sm:$0xff] %v963_v62 }
 0x253   :  { %v932_v63 = vpop.xlane.xlu0 %931 }
 0x254   :  { %v964_v1 = vadd.f32 %v955_v21, %v932_v63 }
 0x256   :  { %980 = vst [vmem:[#allocation6 + $0x40] sm:$0xff] %v964_v1 }
 0x257   :  { %v935_v2 = vpop.xlane.xlu1 %934 }
 0x258   :  { %v965_v3 = vadd.f32 %v955_v21, %v935_v2 }
 0x25a   :  { %981 = vst [vmem:[#allocation6 + $0x48] sm:$0xff] %v965_v3 }
 0x25b   :  { %v938_v4 = vpop.xlane.xlu0 %937 }
 0x25c   :  { %v966_v5 = vadd.f32 %v955_v21, %v938_v4 }
 0x25e   :  { %982 = vst [vmem:[#allocation6 + $0x50] sm:$0xff] %v966_v5 }
 0x25f   :  { %v941_v6 = vpop.xlane.xlu1 %940 }
 0x260   :  { %v967_v7 = vadd.f32 %v955_v21, %v941_v6 }
 0x262   :  { %983 = vst [vmem:[#allocation6 + $0x58] sm:$0xff] %v967_v7 }
 0x263   :  { %v944_v8 = vpop.xlane.xlu0 %943 }
 0x264   :  { %v968_v9 = vadd.f32 %v955_v21, %v944_v8 }
 0x266   :  { %984 = vst [vmem:[#allocation6 + $0x60] sm:$0xff] %v968_v9 }
 0x267   :  { %v947_v10 = vpop.xlane.xlu1 %946 }
 0x268   :  { %v969_v11 = vadd.f32 %v955_v21, %v947_v10 }
 0x26a   :  { %985 = vst [vmem:[#allocation6 + $0x68] sm:$0xff] %v969_v11 }
 0x26b   :  { %v950_v12 = vpop.xlane.xlu0 %949 }
 0x26c   :  { %v970_v13 = vadd.f32 %v955_v21, %v950_v12 }
 0x26e   :  { %986 = vst [vmem:[#allocation6 + $0x70] sm:$0xff] %v970_v13 }
 0x26f   :  { %v953_v14 = vpop.xlane.xlu1 %952 }
 0x270   :  { %v971_v15 = vadd.f32 %v955_v21, %v953_v14 }
 0x272   :  { %987 = vst [vmem:[#allocation6 + $0x78] sm:$0xff] %v971_v15 }
 0x273   :  { %1142 = shalt.err (!%p1139_p9)
}
 0x274   :  { %s1160_s19 = smov 128   ;;  %s1161_s20 = smov 8  }
 0x275   :  { %999 = dma.vmem_to_hbm [thread:$0]  %s994_s17, 2048, %s1722_s9, [#allocation5], %s1160_s19, %s1160_s19, %s1161_s20  }
 0x276   :  { %1153 = dma.done.wait [#allocation5], 2048  }
 0x277   :  { %1154 = vsyncadd [#allocation5], 4294965248 }
 0x278   :  { %1003 = vsyncpa [#allocation4], 1 }
 0x279   :  { %1004 = vsyncpa [#allocation5], 1 }

</bundles_post_ra>
